<compile_context>
chip_gen: v6e
topology: v6e:2x2x1
jax: 0.10.0
libtpu: 0.0.40
codegen_flags: <defaults>
</compile_context>

<pallas_src>
import itertools

import numpy as np
import jax
import jax.numpy as jnp
from jax.experimental import pallas as pl
from jax.experimental.pallas import tpu as pltpu

try:
    from scipy.optimize import linear_sum_assignment as _scipy_lsa
    _HAVE_SCIPY = True
except Exception:          # pragma: no cover
    _HAVE_SCIPY = False


def _round_up(x, m):
    return ((x + m - 1) // m) * m


# --------------------------------------------------------------------------- #
# Pallas kernel: masked |n.x - d| sums, accumulated over N tiles.
#   out[b, p, g] = sum_n gt_mask[b, g, n] * | pred_n[b, p] . x[b, n] - pred_d[b, p] |
# --------------------------------------------------------------------------- #
def _masked_resid_sum_kernel(pts_ref, pn_ref, gm_ref, out_ref):
    ni = pl.program_id(1)

    @pl.when(ni == 0)
    def _():
        out_ref[...] = jnp.zeros_like(out_ref)

    pts = pts_ref[...]                        # (TB, 4, TN)  f32 rows [x, y, z, -1]
    pn = pn_ref[...]                          # (TB, P8, 4)  f32 cols [nx, ny, nz, d]
    gm = gm_ref[...].astype(jnp.float32)      # (TB, G, TN)  {0, 1}

    # |n.x - d| for every (pred plane, point): 4 VPU broadcast-FMAs on the compact
    # (P8, TN) tile — no 128-wide P padding, no MXU dot needed at this size.
    proj = (pn[:, :, 0:1] * pts[:, 0:1, :]
            + pn[:, :, 1:2] * pts[:, 1:2, :]
            + pn[:, :, 2:3] * pts[:, 2:3, :]
            + pn[:, :, 3:4] * pts[:, 3:4, :])            # (TB, P8, TN) f32
    resid = jnp.abs(proj)

    # Masked residual sums per gt plane: per-g multiply + lane reduction.
    # No transpose (avoids the NT contraction entirely); G is small & static.
    n_gt = gm.shape[1]
    for g in range(n_gt):                                 # static unroll
        out_ref[:, :, g:g + 1] += jnp.sum(resid * gm[:, g:g + 1, :],
                                          axis=2, keepdims=True)


def pairwise_costs(points, pred_normals, pred_distances,
                   gt_normals, gt_distances, gt_masks,
                   *, batch_tile=1, n_tile_cap=8192):
    """Returns (cost, cham), each (B, G, P):
         cost[b, g, p] = Hungarian cost for (pred p, gt g)
         cham[b, g, p] = masked point-to-plane mean (0 where the gt mask is empty)
    """
    B, N, _ = points.shape
    P = pred_normals.shape[1]
    G = gt_normals.shape[1]
    f32 = jnp.float32

    P8 = _round_up(P, 8)                       # compute padding only (sublane granule)
    TB = max(1, min(batch_tile, B))            # TB=1 keeps the parallel axis >= B (v7x)
    B_pad = _round_up(B, TB)
    if N <= n_tile_cap:
        TN, N_pad = N, N
    else:
        TN = n_tile_cap                        # multiple of 128
        N_pad = _round_up(N, TN)

    # points as rows [x, y, z, -1] -> (B_pad, 4, N_pad); zero padding is inert
    # (padded mask entries are 0, so they add nothing to the sums).
    pts4 = jnp.concatenate(
        [jnp.swapaxes(points.astype(f32), 1, 2), -jnp.ones((B, 1, N), f32)], axis=1)
    pts4 = jnp.pad(pts4, ((0, B_pad - B), (0, 0), (0, N_pad - N)))

    # pred planes [nx, ny, nz, d] -> (B_pad, P8, 4); padded rows give zero residuals.
    pn4 = jnp.concatenate([pred_normals.astype(f32),
                           pred_distances.reshape(B, P, 1).astype(f32)], axis=2)
    pn4 = jnp.pad(pn4, ((0, B_pad - B), (0, P8 - P), (0, 0)))

    # mask in bf16 ({0,1} exact) — half the f32 DMA; cast to f32 once in-kernel.
    gm = jnp.pad(gt_masks.astype(jnp.bfloat16),
                 ((0, B_pad - B), (0, 0), (0, N_pad - N)))              # (B_pad,G,Npad)

    grid = (B_pad // TB, N_pad // TN)
    grid_spec = pltpu.PrefetchScalarGridSpec(
        num_scalar_prefetch=0,
        grid=grid,
        in_specs=[
            pl.BlockSpec((TB, 4, TN), lambda bi, ni: (bi, 0, ni)),      # points4
            pl.BlockSpec((TB, P8, 4), lambda bi, ni: (bi, 0, 0)),       # pred planes
            pl.BlockSpec((TB, G, TN), lambda bi, ni: (bi, 0, ni)),      # gt masks
        ],
        out_specs=pl.BlockSpec((TB, P8, G), lambda bi, ni: (bi, 0, 0)),  # sums (accum)
    )
    sums_pg = pl.pallas_call(
        _masked_resid_sum_kernel,
        out_shape=jax.ShapeDtypeStruct((B_pad, P8, G), jnp.float32),
        grid_spec=grid_spec,
        compiler_params=pltpu.CompilerParams(
            dimension_semantics=("parallel", "arbitrary"),
            vmem_limit_bytes=32 * 1024 * 1024),
    )(pts4, pn4, gm)

    sums = jnp.swapaxes(sums_pg[:B, :P, :], 1, 2)          # (B, G, P)

    # ---- finalize: tiny (B, G, P) math in plain JAX (independent of N) ---------
    counts = jnp.sum(gt_masks.astype(f32), axis=-1)        # (B, G)  hoisted from kernel
    has = (counts > 0.0)[:, :, None]
    denom = jnp.where(has, counts[:, :, None], 1.0)
    cham_mean = sums / denom
    cham_cost = jnp.where(has, cham_mean, 1.0)              # empty-mask fallback (cost)
    cham_loss = jnp.where(has, cham_mean, 0.0)              # excluded from chamfer loss

    gnf = gt_normals.astype(f32)
    pnf = pred_normals.astype(f32)
    nsim = 1.0 - jnp.abs(jnp.einsum('bgk,bpk->bgp', gnf, pnf))           # (B, G, P)
    ddiff = jnp.abs(gt_distances.astype(f32)[:, :, None]
                    - pred_distances.astype(f32)[:, None, :])            # (B, G, P)
    cost = nsim + 0.5 * ddiff + 5.0 * cham_cost
    return cost, cham_loss


# --------------------------------------------------------------------------- #
# Host-side Hungarian matching (no Pallas equivalent).
# --------------------------------------------------------------------------- #
def _linear_sum_assignment(cost):
    cost = np.asarray(cost)
    if _HAVE_SCIPY:
        rows, cols = _scipy_lsa(cost)
        return np.asarray(rows, np.int64), np.asarray(cols, np.int64)
    # brute-force fallback (fine for small P/G)
    n_rows, n_cols = cost.shape
    if n_rows <= n_cols:
        best_s, best_perm = None, None
        for perm in itertools.permutations(range(n_cols), n_rows):
            s = sum(cost[i, perm[i]] for i in range(n_rows))
            if best_s is None or s < best_s:
                best_s, best_perm = s, perm
        rows = np.arange(n_rows)
        cols = np.array(best_perm, dtype=np.int64)
    else:
        best_s, best_perm = None, None
        for perm in itertools.permutations(range(n_rows), n_cols):
            s = sum(cost[perm[j], j] for j in range(n_cols))
            if best_s is None or s < best_s:
                best_s, best_perm = s, perm
        rows = np.array(best_perm, dtype=np.int64)
        cols = np.arange(n_cols)
        order = np.argsort(rows)
        rows, cols = rows[order], cols[order]
    return rows, cols


# --------------------------------------------------------------------------- #
# Full loss (mirrors ProxyDecoderLoss.forward).
# --------------------------------------------------------------------------- #
def proxy_decoder_loss(pred_planes, gt_planes, points,
                       alpha_param=0.5, beta_chamfer=20.0):
    pred_logits = jnp.asarray(pred_planes['logits'])
    pred_normals = jnp.asarray(pred_planes['normals'])
    pred_distances = jnp.asarray(pred_planes['distances'])
    gt_normals = jnp.asarray(gt_planes['normals'])
    gt_distances = jnp.asarray(gt_planes['distances'])
    gt_masks = jnp.asarray(gt_planes['masks'])
    points = jnp.asarray(points)

    if pred_logits.ndim == 1:
        pred_logits = pred_logits[None]
        pred_normals = pred_normals[None]
        pred_distances = pred_distances[None]
    if gt_normals.ndim == 2:
        gt_normals = gt_normals[None]
        gt_distances = gt_distances[None]
        gt_masks = gt_masks[None]
    if points.ndim == 2:
        points = points[None]

    B, P = pred_logits.shape

    # --- hot path: one Pallas kernel -> masked residual sums; finalize on-device ---
    cost, cham = pairwise_costs(points, pred_normals, pred_distances,
                                gt_normals, gt_distances, gt_masks)

    # only the cost matrix crosses to host (single sync) for Hungarian matching
    # TODO(synk): overlap host matching with the next batch's kernel launch.
    cost_np = np.asarray(jax.device_get(cost))          # (B, G, P)
    pred_rows, gt_cols = [], []
    for b in range(B):
        pi, gi = _linear_sum_assignment(cost_np[b].T)   # (P, G) orientation
        pred_rows.append(pi)
        gt_cols.append(gi)
    pred_idx = jnp.asarray(np.stack(pred_rows).astype(np.int32))   # (B, k)
    gt_idx = jnp.asarray(np.stack(gt_cols).astype(np.int32))       # (B, k)
    k = int(pred_idx.shape[1])

    b_idx = jnp.arange(B)[:, None]

    # classification BCE-with-logits (stable form), mean over preds then batch
    cls_target = jnp.zeros((B, P), jnp.float32).at[b_idx, pred_idx].set(1.0)
    x = pred_logits.astype(jnp.float32)
    bce = jnp.maximum(x, 0.0) - x * cls_target + jnp.log1p(jnp.exp(-jnp.abs(x)))
    cls_loss = jnp.mean(bce)

    if k > 0:
        pn_m = pred_normals.astype(jnp.float32)[b_idx, pred_idx]    # (B, k, 3)
        gn_m = gt_normals.astype(jnp.float32)[b_idx, gt_idx]        # (B, k, 3)
        pd_m = pred_distances.astype(jnp.float32)[b_idx, pred_idx]  # (B, k)
        gd_m = gt_distances.astype(jnp.float32)[b_idx, gt_idx]      # (B, k)
        nsim_m = 1.0 - jnp.abs(jnp.sum(pn_m * gn_m, axis=-1))       # (B, k)
        ddiff_m = jnp.abs(pd_m - gd_m)                              # (B, k)
        cham_m = cham[b_idx, gt_idx, pred_idx]                      # (B, k), 0 if empty
        param_loss = jnp.mean(jnp.mean(nsim_m, axis=1) + jnp.mean(ddiff_m, axis=1))
        chamfer_loss = jnp.mean(jnp.mean(cham_m, axis=1))
    else:
        param_loss = jnp.float32(0.0)
        chamfer_loss = jnp.float32(0.0)

    total = cls_loss + alpha_param * param_loss + beta_chamfer * chamfer_loss
    return total, {'cls_loss': cls_loss, 'param_loss': param_loss,
                   'chamfer_loss': chamfer_loss}


# --------------------------------------------------------------------------- #
# Pure numpy reference for the cost matrix (sanity check of the kernel).
# --------------------------------------------------------------------------- #
def _cost_reference(points, pn, pd, gn, gd, gm):   # returns (B, P, G)
    points, pn, pd, gn, gd, gm = (np.asarray(a, np.float64) for a in
                                  (points, pn, pd, gn, gd, gm))
    B, P = pn.shape[:2]
    G = gn.shape[1]
    cost = np.zeros((B, P, G), np.float64)
    for b in range(B):
        for i in range(P):
            for j in range(G):
                ns = 1.0 - abs(np.sum(pn[b, i] * gn[b, j]))
                dd = abs(pd[b, i] - gd[b, j])
                msk = gm[b, j] > 0
                if msk.any():
                    pts = points[b][msk]
                    ch = np.mean(np.abs(pts @ pn[b, i] - pd[b, i]))
                else:
                    ch = 1.0
                cost[b, i, j] = ns + 0.5 * dd + 5.0 * ch
    return cost


if __name__ == "__main__":
    key = jax.random.PRNGKey(0)
    B, P, G, N = 2, 8, 4, 16
    k = jax.random.split(key, 8)

    pred_logits = jax.random.normal(k[0], (B, P), dtype=jnp.float32)
    pn = jax.random.normal(k[1], (B, P, 3), dtype=jnp.float32)
    pred_normals = pn / jnp.linalg.norm(pn, axis=-1, keepdims=True)
    pred_distances = jax.random.uniform(k[2], (B, P), dtype=jnp.float32)

    gn = jax.random.normal(k[3], (B, G, 3), dtype=jnp.float32)
    gt_normals = gn / jnp.linalg.norm(gn, axis=-1, keepdims=True)
    gt_distances = jax.random.uniform(k[4], (B, G), dtype=jnp.float32)
    gt_masks = jax.random.bernoulli(k[5], 0.5, (B, G, N))
    gt_masks = gt_masks.at[0, 1, :].set(False)   # exercise the empty-mask branch
    points = jax.random.normal(k[6], (B, N, 3), dtype=jnp.float32)

    # sanity-check the Pallas cost matrix against a numpy reference
    # (f32 compute everywhere now -> tight tolerance)
    cost, cham = pairwise_costs(points, pred_normals, pred_distances,
                                gt_normals, gt_distances, gt_masks)
    cost = jax.block_until_ready(cost)
    ref = _cost_reference(points, pred_normals, pred_distances,
                          gt_normals, gt_distances, gt_masks.astype(jnp.float32))
    assert np.allclose(np.asarray(cost).transpose(0, 2, 1), ref,
                       rtol=1e-4, atol=1e-4)

    total, loss_dict = proxy_decoder_loss(
        {'logits': pred_logits, 'normals': pred_normals, 'distances': pred_distances},
        {'normals': gt_normals, 'distances': gt_distances, 'masks': gt_masks},
        points)
    jax.block_until_ready(total)
    print("KERNEL_OK")
</pallas_src>

<mosaic_0001>
module attributes {stable_mosaic.version = 11 : i64} {
  func.func @_masked_resid_sum_kernel(%arg0: i32, %arg1: i32, %arg2: memref<1x4x16xf32, #tpu.memory_space<vmem>>, %arg3: memref<1x8x4xf32, #tpu.memory_space<vmem>>, %arg4: memref<1x4x16xbf16, #tpu.memory_space<vmem>>, %arg5: memref<1x8x4xf32, #tpu.memory_space<vmem>>) attributes {dimension_semantics = [#tpu.dimension_semantics<parallel>, #tpu.dimension_semantics<arbitrary>], iteration_bounds = array<i64: 2, 1>, scalar_prefetch = 0 : i64, scratch_operands = 0 : i64, tpu.core_type = #tpu.core_type<tc>, window_params = [{transform_indices = @transform_0, window_bounds = array<i64: 1, 4, 16>}, {transform_indices = @transform_1, window_bounds = array<i64: 1, 8, 4>}, {transform_indices = @transform_2, window_bounds = array<i64: 1, 4, 16>}, {transform_indices = @transform_3, window_bounds = array<i64: 1, 8, 4>}]} {
    %c0_i32 = arith.constant 0 : i32
    %0 = arith.cmpi eq, %arg1, %c0_i32 : i32
    %1 = arith.extui %0 : i1 to i32
    %c0_i32_0 = arith.constant 0 : i32
    %2 = arith.cmpi ne, %1, %c0_i32_0 : i32
    scf.if %2 {
      %cst_33 = arith.constant 0.000000e+00 : f32
      %63 = vector.broadcast %cst_33 : f32 to vector<1x8x4xf32>
      %c0_34 = arith.constant 0 : index
      %c0_35 = arith.constant 0 : index
      %c0_36 = arith.constant 0 : index
      %64 = vector.load %arg5[%c0_34, %c0_35, %c0_36] : memref<1x8x4xf32, #tpu.memory_space<vmem>>, vector<1x8x4xf32>
      tpu.vector_store %arg5[%c0_34, %c0_35, %c0_36], %63 {strides = array<i32>} : memref<1x8x4xf32, #tpu.memory_space<vmem>>, vector<1x8x4xf32>,
    } else {
    }
    %c0 = arith.constant 0 : index
    %c0_1 = arith.constant 0 : index
    %c0_2 = arith.constant 0 : index
    %3 = vector.load %arg2[%c0, %c0_1, %c0_2] : memref<1x4x16xf32, #tpu.memory_space<vmem>>, vector<1x4x16xf32>
    %c0_3 = arith.constant 0 : index
    %c0_4 = arith.constant 0 : index
    %c0_5 = arith.constant 0 : index
    %4 = vector.load %arg3[%c0_3, %c0_4, %c0_5] : memref<1x8x4xf32, #tpu.memory_space<vmem>>, vector<1x8x4xf32>
    %c0_6 = arith.constant 0 : index
    %c0_7 = arith.constant 0 : index
    %c0_8 = arith.constant 0 : index
    %5 = vector.load %arg4[%c0_6, %c0_7, %c0_8] : memref<1x4x16xbf16, #tpu.memory_space<vmem>>, vector<1x4x16xbf16>
    %6 = arith.extf %5 : vector<1x4x16xbf16> to vector<1x4x16xf32>
    %7 = vector.extract_strided_slice %4 {offsets = [0, 0, 0], sizes = [1, 8, 1], strides = [1, 1, 1]} : vector<1x8x4xf32> to vector<1x8x1xf32>
    %8 = vector.extract_strided_slice %3 {offsets = [0, 0, 0], sizes = [1, 1, 16], strides = [1, 1, 1]} : vector<1x4x16xf32> to vector<1x1x16xf32>
    %9 = vector.broadcast %7 : vector<1x8x1xf32> to vector<1x8x16xf32>
    %10 = vector.broadcast %8 : vector<1x1x16xf32> to vector<1x8x16xf32>
    %11 = arith.mulf %9, %10 : vector<1x8x16xf32>
    %12 = vector.extract_strided_slice %4 {offsets = [0, 0, 1], sizes = [1, 8, 1], strides = [1, 1, 1]} : vector<1x8x4xf32> to vector<1x8x1xf32>
    %13 = vector.extract_strided_slice %3 {offsets = [0, 1, 0], sizes = [1, 1, 16], strides = [1, 1, 1]} : vector<1x4x16xf32> to vector<1x1x16xf32>
    %14 = vector.broadcast %12 : vector<1x8x1xf32> to vector<1x8x16xf32>
    %15 = vector.broadcast %13 : vector<1x1x16xf32> to vector<1x8x16xf32>
    %16 = arith.mulf %14, %15 : vector<1x8x16xf32>
    %17 = arith.addf %11, %16 : vector<1x8x16xf32>
    %18 = vector.extract_strided_slice %4 {offsets = [0, 0, 2], sizes = [1, 8, 1], strides = [1, 1, 1]} : vector<1x8x4xf32> to vector<1x8x1xf32>
    %19 = vector.extract_strided_slice %3 {offsets = [0, 2, 0], sizes = [1, 1, 16], strides = [1, 1, 1]} : vector<1x4x16xf32> to vector<1x1x16xf32>
    %20 = vector.broadcast %18 : vector<1x8x1xf32> to vector<1x8x16xf32>
    %21 = vector.broadcast %19 : vector<1x1x16xf32> to vector<1x8x16xf32>
    %22 = arith.mulf %20, %21 : vector<1x8x16xf32>
    %23 = arith.addf %17, %22 : vector<1x8x16xf32>
    %24 = vector.extract_strided_slice %4 {offsets = [0, 0, 3], sizes = [1, 8, 1], strides = [1, 1, 1]} : vector<1x8x4xf32> to vector<1x8x1xf32>
    %25 = vector.extract_strided_slice %3 {offsets = [0, 3, 0], sizes = [1, 1, 16], strides = [1, 1, 1]} : vector<1x4x16xf32> to vector<1x1x16xf32>
    %26 = vector.broadcast %24 : vector<1x8x1xf32> to vector<1x8x16xf32>
    %27 = vector.broadcast %25 : vector<1x1x16xf32> to vector<1x8x16xf32>
    %28 = arith.mulf %26, %27 : vector<1x8x16xf32>
    %29 = arith.addf %23, %28 : vector<1x8x16xf32>
    %30 = math.absf %29 : vector<1x8x16xf32>
    %c0_9 = arith.constant 0 : index
    %c0_10 = arith.constant 0 : index
    %c0_11 = arith.constant 0 : index
    %31 = vector.load %arg5[%c0_9, %c0_10, %c0_11] : memref<1x8x4xf32, #tpu.memory_space<vmem>>, vector<1x8x1xf32>
    %32 = vector.extract_strided_slice %6 {offsets = [0, 0, 0], sizes = [1, 1, 16], strides = [1, 1, 1]} : vector<1x4x16xf32> to vector<1x1x16xf32>
    %33 = vector.broadcast %32 : vector<1x1x16xf32> to vector<1x8x16xf32>
    %34 = arith.mulf %30, %33 : vector<1x8x16xf32>
    %cst = arith.constant dense<0.000000e+00> : vector<1x8xf32>
    %35 = vector.multi_reduction <add>, %34, %cst [2] : vector<1x8x16xf32> to vector<1x8xf32>
    %36 = vector.shape_cast %35 : vector<1x8xf32> to vector<1x8x1xf32>
    %37 = arith.addf %31, %36 : vector<1x8x1xf32>
    %c0_12 = arith.constant 0 : index
    %c0_13 = arith.constant 0 : index
    %c0_14 = arith.constant 0 : index
    %38 = vector.load %arg5[%c0_12, %c0_13, %c0_14] : memref<1x8x4xf32, #tpu.memory_space<vmem>>, vector<1x8x1xf32>
    tpu.vector_store %arg5[%c0_12, %c0_13, %c0_14], %37 {strides = array<i32>} : memref<1x8x4xf32, #tpu.memory_space<vmem>>, vector<1x8x1xf32>,
    %c0_15 = arith.constant 0 : index
    %c0_16 = arith.constant 0 : index
    %c1 = arith.constant 1 : index
    %39 = vector.load %arg5[%c0_15, %c0_16, %c1] : memref<1x8x4xf32, #tpu.memory_space<vmem>>, vector<1x8x1xf32>
    %40 = vector.extract_strided_slice %6 {offsets = [0, 1, 0], sizes = [1, 1, 16], strides = [1, 1, 1]} : vector<1x4x16xf32> to vector<1x1x16xf32>
    %41 = vector.broadcast %40 : vector<1x1x16xf32> to vector<1x8x16xf32>
    %42 = arith.mulf %30, %41 : vector<1x8x16xf32>
    %cst_17 = arith.constant dense<0.000000e+00> : vector<1x8xf32>
    %43 = vector.multi_reduction <add>, %42, %cst_17 [2] : vector<1x8x16xf32> to vector<1x8xf32>
    %44 = vector.shape_cast %43 : vector<1x8xf32> to vector<1x8x1xf32>
    %45 = arith.addf %39, %44 : vector<1x8x1xf32>
    %c0_18 = arith.constant 0 : index
    %c0_19 = arith.constant 0 : index
    %c1_20 = arith.constant 1 : index
    %46 = vector.load %arg5[%c0_18, %c0_19, %c1_20] : memref<1x8x4xf32, #tpu.memory_space<vmem>>, vector<1x8x1xf32>
    tpu.vector_store %arg5[%c0_18, %c0_19, %c1_20], %45 {strides = array<i32>} : memref<1x8x4xf32, #tpu.memory_space<vmem>>, vector<1x8x1xf32>,
    %c0_21 = arith.constant 0 : index
    %c0_22 = arith.constant 0 : index
    %c2 = arith.constant 2 : index
    %47 = vector.load %arg5[%c0_21, %c0_22, %c2] : memref<1x8x4xf32, #tpu.memory_space<vmem>>, vector<1x8x1xf32>
    %48 = vector.extract_strided_slice %6 {offsets = [0, 2, 0], sizes = [1, 1, 16], strides = [1, 1, 1]} : vector<1x4x16xf32> to vector<1x1x16xf32>
    %49 = vector.broadcast %48 : vector<1x1x16xf32> to vector<1x8x16xf32>
    %50 = arith.mulf %30, %49 : vector<1x8x16xf32>
    %cst_23 = arith.constant dense<0.000000e+00> : vector<1x8xf32>
    %51 = vector.multi_reduction <add>, %50, %cst_23 [2] : vector<1x8x16xf32> to vector<1x8xf32>
    %52 = vector.shape_cast %51 : vector<1x8xf32> to vector<1x8x1xf32>
    %53 = arith.addf %47, %52 : vector<1x8x1xf32>
    %c0_24 = arith.constant 0 : index
    %c0_25 = arith.constant 0 : index
    %c2_26 = arith.constant 2 : index
    %54 = vector.load %arg5[%c0_24, %c0_25, %c2_26] : memref<1x8x4xf32, #tpu.memory_space<vmem>>, vector<1x8x1xf32>
    tpu.vector_store %arg5[%c0_24, %c0_25, %c2_26], %53 {strides = array<i32>} : memref<1x8x4xf32, #tpu.memory_space<vmem>>, vector<1x8x1xf32>,
    %c0_27 = arith.constant 0 : index
    %c0_28 = arith.constant 0 : index
    %c3 = arith.constant 3 : index
    %55 = vector.load %arg5[%c0_27, %c0_28, %c3] : memref<1x8x4xf32, #tpu.memory_space<vmem>>, vector<1x8x1xf32>
    %56 = vector.extract_strided_slice %6 {offsets = [0, 3, 0], sizes = [1, 1, 16], strides = [1, 1, 1]} : vector<1x4x16xf32> to vector<1x1x16xf32>
    %57 = vector.broadcast %56 : vector<1x1x16xf32> to vector<1x8x16xf32>
    %58 = arith.mulf %30, %57 : vector<1x8x16xf32>
    %cst_29 = arith.constant dense<0.000000e+00> : vector<1x8xf32>
    %59 = vector.multi_reduction <add>, %58, %cst_29 [2] : vector<1x8x16xf32> to vector<1x8xf32>
    %60 = vector.shape_cast %59 : vector<1x8xf32> to vector<1x8x1xf32>
    %61 = arith.addf %55, %60 : vector<1x8x1xf32>
    %c0_30 = arith.constant 0 : index
    %c0_31 = arith.constant 0 : index
    %c3_32 = arith.constant 3 : index
    %62 = vector.load %arg5[%c0_30, %c0_31, %c3_32] : memref<1x8x4xf32, #tpu.memory_space<vmem>>, vector<1x8x1xf32>
    tpu.vector_store %arg5[%c0_30, %c0_31, %c3_32], %61 {strides = array<i32>} : memref<1x8x4xf32, #tpu.memory_space<vmem>>, vector<1x8x1xf32>,
    return
  }
  func.func @transform_0(%arg0: i32, %arg1: i32) -> (i32, i32, i32) {
    %c0_i32 = arith.constant 0 : i32
    %c0_i32_0 = arith.constant 0 : i32
    return %arg0, %c0_i32, %arg1 : i32, i32, i32
  }
  func.func @transform_1(%arg0: i32, %arg1: i32) -> (i32, i32, i32) {
    %c0_i32 = arith.constant 0 : i32
    %c0_i32_0 = arith.constant 0 : i32
    %c0_i32_1 = arith.constant 0 : i32
    return %arg0, %c0_i32, %c0_i32_0 : i32, i32, i32
  }
  func.func @transform_2(%arg0: i32, %arg1: i32) -> (i32, i32, i32) {
    %c0_i32 = arith.constant 0 : i32
    %c0_i32_0 = arith.constant 0 : i32
    return %arg0, %c0_i32, %arg1 : i32, i32, i32
  }
  func.func @transform_3(%arg0: i32, %arg1: i32) -> (i32, i32, i32) {
    %c0_i32 = arith.constant 0 : i32
    %c0_i32_0 = arith.constant 0 : i32
    %c0_i32_1 = arith.constant 0 : i32
    return %arg0, %c0_i32, %c0_i32_0 : i32, i32, i32
  }
}

</mosaic_0001>

<bundles_post_ra>
// kernel: tpu_custom_call.1
= control target key start
LH: loop header
LB: loop body
LE: loop exit
PB: predicated region body
PF: predicated region fallthrough
CT: control target
= control target key end

     0   :  { %s519_s12 = smov 0   ;;  %s521_s13 = smov 0   ;;  %s578_s0 = inlined_call_operand.vmem [shape: f32[2,4,16], index: 0, kind: input, shape index: {}]   ;;  %s579_s1 = inlined_call_operand.vmem [shape: f32[2,8,4], index: 1, kind: input, shape index: {}]   ;;  %s580_s2 = inlined_call_operand.vmem [shape: bf16[2,4,16], index: 2, kind: input, shape index: {}]   ;;  %s581_s3 = inlined_call_operand.vmem [shape: f32[2,8,4], index: 3, kind: output, shape index: {}]  }
   0x1   :  { %s523_s14 = smov 0  }
   0x2 LB: > { %s25_s15 = sadd.s32 1, %s488_s13  ;;  %p429_p0 = scmp.ge.s32.totalorder %s492_s14, 1  ;;  %s492_s14 = sphi %s523_s14, %s13_s14   ;;  %s488_s13 = sphi %s521_s13, %s583_s13   ;;  %s484_s12 = sphi %s519_s12, %s582_s12  }
   0x3   : > { %p27_p1 = scmp.ge.s32.totalorder %s25_s15, 2  ;;  %p176_p2 = scmp.lt.s32.totalorder %s492_s14, 3 }
   0x5   : > { %s585_s15 = smov (%p27_p1, %s25_s15), 0  ;;  %p177_p3 = pnand %p429_p0, %p176_p2 }
   0x6   : > { %p212_p4 = scmp.lt.s32.totalorder (!%p177_p3), %s484_s12, 1 }
   0x7   : > { %180 = sbr.rel (%p177_p3) target bundleno = 329 (0x149), region = 32 }
   0xc   : > { %v494_v0 = vmov 0   ;;  %v495_v1 = vmov 2   ;;  %s587_s12 = smov (!%p212_p4, %s484_s12), 1  ;;  %v496_v3 = vmov 1   ;;  %v497_v4 = vmov 3  }
   0xd   : > { %465 = vset.pattern.permute.xlu0 %v494_v0  ;;  %467 = vset.pattern.permute.xlu1 %v495_v1  ;;  %s431_s16 = sshll.u32 %s587_s12, 3  ;;  %v249_v5 = vlaneseq  ;;  %s430_s20 = sshll.u32 %s587_s12, 2  ;;  %vm291_vm0 = vcmask 130048   ;;  %vm238_vm1 = vcmask 31744   ;;  %v498_v40 = vmov 0.0  }
   0xe   : > { %s222_s19 = scalar_lea.vmem %s579_s1, %s431_s16  ;;  %s218_s23 = scalar_lea.vmem %s578_s0, %s430_s20  ;;  %vm296_vm2 = vcmask 7168   ;;  %vm308_vm3 = vcmask 15368   ;;  %vm320_vm4 = vcmask 23568   ;;  %vm332_vm5 = vcmask 31768  }
   0xf   : > { %v241_v2 = vld [vmem:[%s222_s19] sm:$0xff]  ;;  %v250_v6 = vshrl.u32 %v249_v5, 7  ;;  %s432_s24 = sshll.u32 %s587_s12, 1  ;;  %s558_s30 = scalar_lea.vmem %s581_s3, %s431_s16 }
  0x10   : > { %246 = vperm.xlu0 %465, %v241_v2   ;;  %265 = vperm.xlu1 %467, %v241_v2   ;;  %v240_v9 = vld [vmem:[%s218_s23] sm:$0xf]  ;;  %s229_s27 = scalar_lea.vmem %s580_s2, %s432_s24  ;;  %239 = vst.msk [vmem:[%s558_s30] sm:$0xff] %vm238_vm1, %v498_v40 }
  0x11   : > { %v251_v7 = vsub.s32 0, %v250_v6  ;;  %v260_v8 = vsub.s32 1, %v250_v6  ;;  %v270_v11 = vsub.s32 2, %v250_v6  ;;  %v280_v13 = vsub.s32 3, %v250_v6  ;;  %v242_v20 = vld [vmem:[%s229_s27] sm:$0x3] }
  0x12   : > { %v243_v26 = vunpack.c.l.bf16 %v242_v20 }
  0x13   : > { %v252_v14 = vrot.slane %v240_v9, %v251_v7  ;;  %v261_v15 = vrot.slane %v240_v9, %v260_v8  ;;  %v271_v16 = vrot.slane %v240_v9, %v270_v11  ;;  %v281_v17 = vrot.slane %v240_v9, %v280_v13 }
  0x14   : > { %466 = vset.pattern.permute.xlu0 %v496_v3  ;;  %468 = vset.pattern.permute.xlu1 %v497_v4  ;;  %v302_v29 = vrot.slane %v243_v26, %v260_v8  ;;  %v289_v30 = vrot.slane %v243_v26, %v251_v7  ;;  %v314_v32 = vrot.slane %v243_v26, %v270_v11 }
  0x15   : > { %255 = vperm.xlu0 %466, %v241_v2   ;;  %275 = vperm.xlu1 %468, %v241_v2   ;;  %v326_v33 = vrot.slane %v243_v26, %v280_v13 }
  0x17   : > { %v285_v43 = vld [vmem:[%s558_s30] sm:$0xff] }
  0x19   : > { %469 = vset.pattern.permute.xlu0 %v497_v4 }
  0x8b   : > { %v247_v10 = vpop.permute.xlu0 %246  ;;  %v266_v12 = vpop.permute.xlu1 %265 }
  0x8c   : > { %v253_v21 = vmul.f32 %v252_v14, %v247_v10  ;;  %v272_v23 = vmul.f32 %v271_v16, %v266_v12 }
  0x90   : > { %v256_v18 = vpop.permute.xlu0 %255  ;;  %v276_v19 = vpop.permute.xlu1 %275 }
  0x91   : > { %v262_v22 = vmul.f32 %v261_v15, %v256_v18  ;;  %v282_v25 = vmul.f32 %v281_v17, %v276_v19 }
  0x93   : > { %v263_v24 = vadd.f32 %v262_v22, %v253_v21 }
  0x95   : > { %v273_v27 = vadd.f32 %v272_v23, %v263_v24 }
  0x97   : > { %v283_v28 = vadd.f32 %v282_v25, %v273_v27 }
  0x99   : > { %v284_v31 = vand.u32 2147483647, %v283_v28 }
  0x9b   : > { %v303_v34 = vmul.f32 %v302_v29, %v284_v31  ;;  %v290_v35 = vmul.f32 %v289_v30, %v284_v31  ;;  %v315_v38 = vmul.f32 %v314_v32, %v284_v31  ;;  %v327_v39 = vmul.f32 %v326_v33, %v284_v31 }
  0x9d   : > { %v304_v36 = vsel %vm291_vm0, %v303_v34, 0.0  ;;  %v292_v37 = vsel %vm291_vm0, %v290_v35, 0.0  ;;  %v316_v41 = vsel %vm291_vm0, %v315_v38, 0.0  ;;  %v328_v42 = vsel %vm291_vm0, %v327_v39, 0.0 }
  0x9e   : > { %305 = vadd.xlane.f32.xlu0 %v304_v36  ;;  %293 = vadd.xlane.f32.xlu1 %v292_v37 }
  0xa2   : > { %317 = vadd.xlane.f32.xlu0 %v316_v41  ;;  %329 = vadd.xlane.f32.xlu1 %v328_v42 }
 0x127   : > { %v294_v44 = vpop.xlane.xlu1 %293  ;;  %v306_v46 = vpop.xlane.xlu0 %305 }
 0x128   : > { %v295_v45 = vadd.f32 %v294_v44, %v285_v43 }
 0x12a   : > { %297 = vst.msk [vmem:[%s558_s30] sm:$0xff] %vm296_vm2, %v295_v45 }
 0x12b   : > { %v318_v49 = vpop.xlane.xlu0 %317  ;;  %v330_v53 = vpop.xlane.xlu1 %329 }
 0x131   : > { %v298_v47 = vld [vmem:[%s558_s30] sm:$0xff] }
 0x132   : > { %v307_v48 = vadd.f32 %v306_v46, %v298_v47 }
 0x134   : > { %309 = vst.msk [vmem:[%s558_s30] sm:$0xff] %vm308_vm3, %v307_v48 }
 0x13b   : > { %v310_v50 = vld [vmem:[%s558_s30] sm:$0xff] }
 0x13c   : > { %v319_v51 = vadd.f32 %v318_v49, %v310_v50 }
 0x13e   : > { %321 = vst.msk [vmem:[%s558_s30] sm:$0xff] %vm320_vm4, %v319_v51 }
 0x145   : > { %v322_v52 = vld [vmem:[%s558_s30] sm:$0xff] }
 0x146   : > { %v331_v54 = vadd.f32 %v330_v53, %v322_v52 }
 0x148   : > { %333 = vst.msk [vmem:[%s558_s30] sm:$0xff] %vm332_vm5, %v331_v54 }
 0x149 PF: > { %s13_s14 = sadd.s32 1, %s492_s14   ;;  %s582_s12 = smov %s488_s13 }
 0x14a   : > { %p10_p5 = scmp.ge.s32.totalorder %s13_s14, 4   ;;  %s583_s13 = smov %s585_s15 }
 0x14c   :  { %12 = sbr.rel (!%p10_p5) target bundleno = 2 (0x2), region = 72 }

</bundles_post_ra>
